<compile_context>
chip_gen: v6e
topology: v6e:2x2x1
jax: 0.10.0
libtpu: 0.0.40
codegen_flags: <defaults>
</compile_context>

<pallas_src>
import jax
import jax.numpy as jnp
from jax import lax
from jax.experimental import pallas as pl
from jax.experimental.pallas import tpu as pltpu


def _eiie_cnn_kernel(x_ref, pw_ref, wbig_ref, sbig_ref, bc_ref,
                     wscore_ref, wpw_ref, b3_ref, out_ref):
    x = x_ref[...]                                       # (TB, F*A*W), natural NCHW rows

    # conv_2d + EIIEDense folded into one block-diagonal matmul; the second matmul
    # (0/1 selection matrix) extracts each asset's feature-0 closing price, already
    # replicated once per dense channel.  Same LHS -> x stays in vregs.
    z = jnp.dot(x, wbig_ref[...], preferred_element_type=jnp.float32)       # (TB, A*(NA-1))
    close = jnp.dot(x, sbig_ref[...], preferred_element_type=jnp.float32)   # (TB, A*(NA-1))

    # price normalization commutes with the per-asset block-diagonal matmul
    h = jnp.maximum(z * pl.reciprocal(close) + bc_ref[...], 0.0)            # EIIEDense ReLU

    # EIIEOutputWithW: 1x1 conv over dense channels + previous_w channel; the cash
    # column is column 0 of the same (TB, NA) tile (zero column in wscore, unit lane
    # weight in wpw), so there is no concatenate and a single dense store.
    logits = (jnp.dot(h, wscore_ref[...], preferred_element_type=jnp.float32)
              + pw_ref[...] * wpw_ref[...] + b3_ref[...])                   # (TB, NA)

    # row softmax
    m = jnp.max(logits, axis=1, keepdims=True)
    e = jnp.exp(logits - m)
    out_ref[...] = e * pl.reciprocal(jnp.sum(e, axis=1, keepdims=True))


_TARGET_BLOCK_BYTES = 2 * 1024 * 1024      # ~2 MiB x block per grid step
_MIN_SPLIT_BYTES = 512 * 1024              # only split if each tile still carries >=0.5 MiB


def _choose_batch_tile(batch, row_bytes):
    if batch * row_bytes < 2 * _MIN_SPLIT_BYTES:
        return batch                       # one grid step; block == full array (always legal)
    tb = min(max(8, _TARGET_BLOCK_BYTES // row_bytes), (batch + 1) // 2)
    tb = ((tb + 7) // 8) * 8               # 8-aligned sublane tiles; last tile may be ragged
    return batch if tb >= batch else tb


def eiie_cnn_forward(x, previous_w, params):
    """x: (B, F, A, W) NCHW prices; previous_w: (B, NA) with NA = A + 1."""
    B, F, A, W = x.shape
    NA = previous_w.shape[1]
    assert NA == A + 1, "previous_w must have num_assets = assets + 1 entries"
    w1, b1, w2, b2, w3, b3 = params
    C = NA - 1                                           # EIIEDense output channels
    FW, FWm1, FAW = F * W, F * (W - 1), F * A * W
    f32 = jnp.float32
    hp = jax.lax.Precision.HIGHEST

    # ---- host-side parameter folding (tiny matrices, exact/high precision) ----
    # conv_2d (kernel (1,2)) as an exact structured matmul over (feature, window) lanes
    w1a = w1[:, :, 0, 0].astype(f32)                     # tap 0: (F_out, F_in)
    w1b = w1[:, :, 0, 1].astype(f32)                     # tap 1
    e0 = jnp.eye(W, W - 1, dtype=f32)                    # selects w == t
    e1 = jnp.eye(W, W - 1, k=-1, dtype=f32)              # selects w == t + 1
    m1 = (jnp.einsum('oi,wt->iwot', w1a, e0, precision=hp)
          + jnp.einsum('oi,wt->iwot', w1b, e1, precision=hp)).reshape(FW, FWm1)
    b1r = jnp.repeat(b1.astype(f32), W - 1).reshape(1, FWm1)
    w2t = w2[:, :, 0, :].reshape(C, FWm1).astype(f32).T  # (FWm1, C)
    b2r = b2.reshape(1, C).astype(f32)
    # no nonlinearity between conv_2d and EIIEDense -> fold the two convs into one
    wc = jnp.dot(m1, w2t, precision=hp)                  # (F*W, C)
    bc = jnp.dot(b1r, w2t, precision=hp) + b2r           # (1, C)
    # block-diagonal over assets so rows stay = batch, columns = (asset, channel)
    eye_a = jnp.eye(A, dtype=f32)
    w_big = jnp.einsum('fwc,ab->fawbc', wc.reshape(F, W, C), eye_a).reshape(FAW, A * C)
    bc_big = jnp.tile(bc, (1, A))                        # (1, A*C), channel fastest
    # 0/1 selection: column (a, c) picks x[:, 0, a, W-1] (normalizing close price)
    sel = jnp.zeros((F, W), f32).at[0, W - 1].set(1.0)
    s_big = jnp.einsum('fw,ab,c->fawbc', sel, eye_a,
                       jnp.ones((C,), f32)).reshape(FAW, A * C)
    # EIIEOutputWithW 1x1 conv (+ previous_w channel + cash column) as a score matmul
    w3h = w3[0, :C, 0, 0].astype(f32)                    # dense-channel weights (C,)
    w3p = w3[0, C, 0, 0].astype(f32)                     # previous_w-channel weight
    eye_a1 = jnp.eye(A, NA, k=1, dtype=f32)              # column j == asset a + 1
    w_score = jnp.einsum('c,aj->acj', w3h, eye_a1).reshape(A * C, NA)   # cash column = 0
    w_pw = jnp.concatenate([jnp.ones((1, 1), f32), jnp.full((1, A), w3p, f32)], axis=1)
    b3v = jnp.concatenate([jnp.zeros((1, 1), f32), jnp.full((1, A), b3[0], f32)], axis=1)

    # ---- activations: free views, no repack / padding traffic ----
    xk = x.astype(f32).reshape(B, FAW)                   # contiguous NCHW flatten (view)
    pwk = previous_w.astype(f32)

    tb = _choose_batch_tile(B, FAW * 4)
    grid = (pl.cdiv(B, tb),)

    def const(shape):                                    # fully-resident weight block
        return pl.BlockSpec(shape, lambda i, _n=len(shape): (0,) * _n)

    out = pl.pallas_call(
        _eiie_cnn_kernel,
        out_shape=jax.ShapeDtypeStruct((B, NA), f32),
        grid=grid,
        in_specs=[
            pl.BlockSpec((tb, FAW), lambda i: (i, 0)),   # x rows for this batch tile
            pl.BlockSpec((tb, NA), lambda i: (i, 0)),    # previous_w for this tile
            const((FAW, A * C)),                         # folded conv_2d + EIIEDense weight
            const((FAW, A * C)),                         # close-price selection matrix
            const((1, A * C)),                           # folded bias
            const((A * C, NA)),                          # output-conv score matrix
            const((1, NA)),                              # previous_w / cash lane weights
            const((1, NA)),                              # output bias lanes
        ],
        out_specs=pl.BlockSpec((tb, NA), lambda i: (i, 0)),
        compiler_params=pltpu.CompilerParams(dimension_semantics=("parallel",)),
    )(xk, pwk, w_big, s_big, bc_big, w_score, w_pw, b3v)
    return out


def ref_forward(x, previous_w, params):
    """Pure-JAX reference reproducing the PyTorch module exactly."""
    w1, b1, w2, b2, w3, b3 = params
    dn = ("NCHW", "OIHW", "NCHW")
    t = x / x[:, 0:1, :, -1:]
    t = lax.conv_general_dilated(t, w1, (1, 1), "VALID", dimension_numbers=dn)
    t = t + b1[None, :, None, None]
    t = lax.conv_general_dilated(t, w2, (1, 1), "VALID", dimension_numbers=dn)
    t = jax.nn.relu(t + b2[None, :, None, None])
    B, feat, A, width = t.shape
    cash = previous_w[:, 0:1]
    pw_nc = previous_w[:, 1:].reshape(B, 1, A, 1)
    t = t.reshape(B, width * feat, A, 1)
    t = jnp.concatenate([t, pw_nc], axis=1)
    t = lax.conv_general_dilated(t, w3, (1, 1), "VALID", dimension_numbers=dn)
    t = t + b3[None, :, None, None]
    t = t.reshape(B, A)
    logits = jnp.concatenate([cash, t], axis=1)
    return jax.nn.softmax(logits, axis=1)


if __name__ == "__main__":
    # EIIECNN(num_features=3, num_assets=5, window_size=16, kernel_size=(1, 2))
    B, F, NA, W = 2, 3, 5, 16
    A = NA - 1  # non-cash assets (spatial H dimension of the NCHW input)

    key = jax.random.PRNGKey(0)
    k = jax.random.split(key, 8)
    x = jax.random.uniform(k[0], (B, F, A, W), jnp.float32, 0.5, 1.5)   # positive "prices"
    pw_raw = jax.random.uniform(k[1], (B, NA), jnp.float32, 0.1, 1.0)
    previous_w = pw_raw / jnp.sum(pw_raw, axis=1, keepdims=True)

    # deterministic synthetic parameters (Conv2d shapes from the module __init__)
    w1 = 0.2 * jax.random.normal(k[2], (F, F, 1, 2), jnp.float32)           # conv_2d
    b1 = 0.1 * jax.random.normal(k[3], (F,), jnp.float32)
    w2 = 0.2 * jax.random.normal(k[4], (NA - 1, F, 1, W - 1), jnp.float32)  # EIIEDense
    b2 = 0.1 * jax.random.normal(k[5], (NA - 1,), jnp.float32)
    w3 = 0.2 * jax.random.normal(k[6], (1, NA, 1, 1), jnp.float32)          # EIIEOutputWithW
    b3 = 0.1 * jax.random.normal(k[7], (1,), jnp.float32)
    params = (w1, b1, w2, b2, w3, b3)

    out = eiie_cnn_forward(x, previous_w, params)
    out = jax.block_until_ready(out)

    ref = ref_forward(x, previous_w, params)
    assert out.shape == (B, NA)
    assert bool(jnp.allclose(jnp.sum(out, axis=1), 1.0, atol=1e-5)), "rows must sum to 1"
    assert bool(jnp.allclose(out, ref, rtol=1e-4, atol=1e-4)), (out, ref)
    print("KERNEL_OK")
</pallas_src>

<mosaic_0001>
module attributes {stable_mosaic.version = 11 : i64} {
  func.func @_eiie_cnn_kernel(%arg0: i32, %arg1: memref<2x192xf32, #tpu.memory_space<vmem>>, %arg2: memref<2x5xf32, #tpu.memory_space<vmem>>, %arg3: memref<192x16xf32, #tpu.memory_space<vmem>>, %arg4: memref<192x16xf32, #tpu.memory_space<vmem>>, %arg5: memref<1x16xf32, #tpu.memory_space<vmem>>, %arg6: memref<16x5xf32, #tpu.memory_space<vmem>>, %arg7: memref<1x5xf32, #tpu.memory_space<vmem>>, %arg8: memref<1x5xf32, #tpu.memory_space<vmem>>, %arg9: memref<2x5xf32, #tpu.memory_space<vmem>>) attributes {dimension_semantics = [#tpu.dimension_semantics<parallel>], iteration_bounds = array<i64: 1>, scalar_prefetch = 0 : i64, scratch_operands = 0 : i64, tpu.core_type = #tpu.core_type<tc>, window_params = [{transform_indices = @transform_0, window_bounds = array<i64: 2, 192>}, {transform_indices = @transform_1, window_bounds = array<i64: 2, 5>}, {pipeline_mode = #tpu.pipeline_mode<synchronous>, transform_indices = @transform_2, window_bounds = array<i64: 192, 16>}, {pipeline_mode = #tpu.pipeline_mode<synchronous>, transform_indices = @transform_3, window_bounds = array<i64: 192, 16>}, {pipeline_mode = #tpu.pipeline_mode<synchronous>, transform_indices = @transform_4, window_bounds = array<i64: 1, 16>}, {pipeline_mode = #tpu.pipeline_mode<synchronous>, transform_indices = @transform_5, window_bounds = array<i64: 16, 5>}, {pipeline_mode = #tpu.pipeline_mode<synchronous>, transform_indices = @transform_6, window_bounds = array<i64: 1, 5>}, {pipeline_mode = #tpu.pipeline_mode<synchronous>, transform_indices = @transform_7, window_bounds = array<i64: 1, 5>}, {transform_indices = @transform_8, window_bounds = array<i64: 2, 5>}]} {
    %c0 = arith.constant 0 : index
    %c0_0 = arith.constant 0 : index
    %0 = vector.load %arg1[%c0, %c0_0] : memref<2x192xf32, #tpu.memory_space<vmem>>, vector<2x192xf32>
    %c0_1 = arith.constant 0 : index
    %c0_2 = arith.constant 0 : index
    %1 = vector.load %arg3[%c0_1, %c0_2] : memref<192x16xf32, #tpu.memory_space<vmem>>, vector<192x16xf32>
    %cst = arith.constant dense<0.000000e+00> : vector<2x16xf32>
    %2 = tpu.matmul %0, %1, %cst {dimension_numbers = #tpu.dot_dimension_numbers<[1], [0], [0], [1], [0, 0, 1, 1], [], []>} : vector<2x192xf32>, vector<192x16xf32>, vector<2x16xf32> -> vector<2x16xf32>
    %c0_3 = arith.constant 0 : index
    %c0_4 = arith.constant 0 : index
    %3 = vector.load %arg4[%c0_3, %c0_4] : memref<192x16xf32, #tpu.memory_space<vmem>>, vector<192x16xf32>
    %cst_5 = arith.constant dense<0.000000e+00> : vector<2x16xf32>
    %4 = tpu.matmul %0, %3, %cst_5 {dimension_numbers = #tpu.dot_dimension_numbers<[1], [0], [0], [1], [0, 0, 1, 1], [], []>} : vector<2x192xf32>, vector<192x16xf32>, vector<2x16xf32> -> vector<2x16xf32>
    %5 = tpu.reciprocal %4 : vector<2x16xf32> -> vector<2x16xf32>
    %6 = arith.mulf %2, %5 : vector<2x16xf32>
    %c0_6 = arith.constant 0 : index
    %c0_7 = arith.constant 0 : index
    %7 = vector.load %arg5[%c0_6, %c0_7] : memref<1x16xf32, #tpu.memory_space<vmem>>, vector<1x16xf32>
    %8 = vector.broadcast %7 : vector<1x16xf32> to vector<2x16xf32>
    %9 = arith.addf %6, %8 : vector<2x16xf32>
    %cst_8 = arith.constant 0.000000e+00 : f32
    %10 = vector.broadcast %cst_8 : f32 to vector<2x16xf32>
    %11 = arith.maximumf %9, %10 : vector<2x16xf32>
    %c0_9 = arith.constant 0 : index
    %c0_10 = arith.constant 0 : index
    %12 = vector.load %arg6[%c0_9, %c0_10] : memref<16x5xf32, #tpu.memory_space<vmem>>, vector<16x5xf32>
    %cst_11 = arith.constant dense<0.000000e+00> : vector<2x5xf32>
    %13 = tpu.matmul %11, %12, %cst_11 {dimension_numbers = #tpu.dot_dimension_numbers<[1], [0], [0], [1], [0, 0, 1, 1], [], []>} : vector<2x16xf32>, vector<16x5xf32>, vector<2x5xf32> -> vector<2x5xf32>
    %c0_12 = arith.constant 0 : index
    %c0_13 = arith.constant 0 : index
    %14 = vector.load %arg2[%c0_12, %c0_13] : memref<2x5xf32, #tpu.memory_space<vmem>>, vector<2x5xf32>
    %c0_14 = arith.constant 0 : index
    %c0_15 = arith.constant 0 : index
    %15 = vector.load %arg7[%c0_14, %c0_15] : memref<1x5xf32, #tpu.memory_space<vmem>>, vector<1x5xf32>
    %16 = vector.broadcast %15 : vector<1x5xf32> to vector<2x5xf32>
    %17 = arith.mulf %14, %16 : vector<2x5xf32>
    %18 = arith.addf %13, %17 : vector<2x5xf32>
    %c0_16 = arith.constant 0 : index
    %c0_17 = arith.constant 0 : index
    %19 = vector.load %arg8[%c0_16, %c0_17] : memref<1x5xf32, #tpu.memory_space<vmem>>, vector<1x5xf32>
    %20 = vector.broadcast %19 : vector<1x5xf32> to vector<2x5xf32>
    %21 = arith.addf %18, %20 : vector<2x5xf32>
    %cst_18 = arith.constant dense<0xFF800000> : vector<2xf32>
    %22 = vector.multi_reduction <maximumf>, %21, %cst_18 [1] : vector<2x5xf32> to vector<2xf32>
    %23 = vector.shape_cast %22 : vector<2xf32> to vector<2x1xf32>
    %24 = vector.broadcast %23 : vector<2x1xf32> to vector<2x5xf32>
    %25 = arith.subf %21, %24 : vector<2x5xf32>
    %26 = math.exp %25 : vector<2x5xf32>
    %cst_19 = arith.constant dense<0.000000e+00> : vector<2xf32>
    %27 = vector.multi_reduction <add>, %26, %cst_19 [1] : vector<2x5xf32> to vector<2xf32>
    %28 = vector.shape_cast %27 : vector<2xf32> to vector<2x1xf32>
    %29 = tpu.reciprocal %28 : vector<2x1xf32> -> vector<2x1xf32>
    %30 = vector.broadcast %29 : vector<2x1xf32> to vector<2x5xf32>
    %31 = arith.mulf %26, %30 : vector<2x5xf32>
    %c0_20 = arith.constant 0 : index
    %c0_21 = arith.constant 0 : index
    %32 = vector.load %arg9[%c0_20, %c0_21] : memref<2x5xf32, #tpu.memory_space<vmem>>, vector<2x5xf32>
    tpu.vector_store %arg9[%c0_20, %c0_21], %31 {strides = array<i32>} : memref<2x5xf32, #tpu.memory_space<vmem>>, vector<2x5xf32>,
    return
  }
  func.func @transform_0(%arg0: i32) -> (i32, i32) {
    %c0_i32 = arith.constant 0 : i32
    %c0_i32_0 = arith.constant 0 : i32
    return %arg0, %c0_i32 : i32, i32
  }
  func.func @transform_1(%arg0: i32) -> (i32, i32) {
    %c0_i32 = arith.constant 0 : i32
    %c0_i32_0 = arith.constant 0 : i32
    return %arg0, %c0_i32 : i32, i32
  }
  func.func @transform_2(%arg0: i32) -> (i32, i32) {
    %c0_i32 = arith.constant 0 : i32
    %c0_i32_0 = arith.constant 0 : i32
    %c0_i32_1 = arith.constant 0 : i32
    return %c0_i32, %c0_i32_0 : i32, i32
  }
  func.func @transform_3(%arg0: i32) -> (i32, i32) {
    %c0_i32 = arith.constant 0 : i32
    %c0_i32_0 = arith.constant 0 : i32
    %c0_i32_1 = arith.constant 0 : i32
    return %c0_i32, %c0_i32_0 : i32, i32
  }
  func.func @transform_4(%arg0: i32) -> (i32, i32) {
    %c0_i32 = arith.constant 0 : i32
    %c0_i32_0 = arith.constant 0 : i32
    %c0_i32_1 = arith.constant 0 : i32
    return %c0_i32, %c0_i32_0 : i32, i32
  }
  func.func @transform_5(%arg0: i32) -> (i32, i32) {
    %c0_i32 = arith.constant 0 : i32
    %c0_i32_0 = arith.constant 0 : i32
    %c0_i32_1 = arith.constant 0 : i32
    return %c0_i32, %c0_i32_0 : i32, i32
  }
  func.func @transform_6(%arg0: i32) -> (i32, i32) {
    %c0_i32 = arith.constant 0 : i32
    %c0_i32_0 = arith.constant 0 : i32
    %c0_i32_1 = arith.constant 0 : i32
    return %c0_i32, %c0_i32_0 : i32, i32
  }
  func.func @transform_7(%arg0: i32) -> (i32, i32) {
    %c0_i32 = arith.constant 0 : i32
    %c0_i32_0 = arith.constant 0 : i32
    %c0_i32_1 = arith.constant 0 : i32
    return %c0_i32, %c0_i32_0 : i32, i32
  }
  func.func @transform_8(%arg0: i32) -> (i32, i32) {
    %c0_i32 = arith.constant 0 : i32
    %c0_i32_0 = arith.constant 0 : i32
    return %arg0, %c0_i32 : i32, i32
  }
}

</mosaic_0001>

<bundles_post_ra>
// kernel: tpu_custom_call.1
= control target key start
LH: loop header
LB: loop body
LE: loop exit
PB: predicated region body
PF: predicated region fallthrough
CT: control target
= control target key end

     0   :  { %v411_v1 = vmov 0.0   ;;  %s683_s0 = inlined_call_operand.vmem [shape: f32[2,192], index: 0, kind: input, shape index: {}]   ;;  %s684_s1 = inlined_call_operand.vmem [shape: f32[2,5], index: 1, kind: input, shape index: {}]   ;;  %s685_s2 = inlined_call_operand.vmem [shape: f32[192,16], index: 2, kind: input, shape index: {}]   ;;  %s686_s3 = inlined_call_operand.vmem [shape: f32[192,16], index: 3, kind: input, shape index: {}]   ;;  %s687_s4 = inlined_call_operand.vmem [shape: f32[1,16], index: 4, kind: input, shape index: {}]   ;;  %s688_s5 = inlined_call_operand.vmem [shape: f32[16,5], index: 5, kind: input, shape index: {}]   ;;  %s689_s6 = inlined_call_operand.vmem [shape: f32[1,5], index: 6, kind: input, shape index: {}]   ;;  %s690_s7 = inlined_call_operand.vmem [shape: f32[1,5], index: 7, kind: input, shape index: {}]   ;;  %s691_s8 = inlined_call_operand.hbm [shape: f32[2,5], index: 8, kind: output, shape index: {}]  }
   0x1   :  { %v153_v0 = vld [vmem:[%s686_s3 + $0x78] sm:$0xff]  ;;  %162 = vmatprep.subr.mxu1 %v411_v1  ;;  %v152_v2 = vld [vmem:[%s686_s3 + $0x70] sm:$0xff]  ;;  %68 = vmatprep.subr.mxu0 %v411_v1  ;;  %v151_v5 = vld [vmem:[%s686_s3 + $0x68] sm:$0xff] }
   0x2   :  { %163 = vmatpush1.msra.mxu1 %v153_v0  ;;  %v46_v3 = vld [vmem:[%s685_s2 + $0x78] sm:$0xff]  ;;  %v45_v4 = vld [vmem:[%s685_s2 + $0x70] sm:$0xff]  ;;  %v44_v6 = vld [vmem:[%s685_s2 + $0x68] sm:$0xff] }
   0x3   :  { %164 = vmatprep.subr.mxu1 %v411_v1  ;;  %69 = vmatpush1.msra.mxu0 %v46_v3  ;;  %v150_v7 = vld [vmem:[%s686_s3 + $0x60] sm:$0xff]  ;;  %v149_v9 = vld [vmem:[%s686_s3 + $0x58] sm:$0xff]  ;;  %v148_v11 = vld [vmem:[%s686_s3 + $0x50] sm:$0xff] }
   0x4   :  { %165 = vmatpush1.msra.mxu1 %v152_v2  ;;  %70 = vmatprep.subr.mxu0 %v411_v1  ;;  %v43_v8 = vld [vmem:[%s685_s2 + $0x60] sm:$0xff]  ;;  %v42_v10 = vld [vmem:[%s685_s2 + $0x58] sm:$0xff]  ;;  %v41_v12 = vld [vmem:[%s685_s2 + $0x50] sm:$0xff] }
   0x5   :  { %166 = vmatprep.subr.mxu1 %v411_v1  ;;  %71 = vmatpush1.msra.mxu0 %v45_v4  ;;  %v147_v13 = vld [vmem:[%s686_s3 + $0x48] sm:$0xff]  ;;  %v146_v15 = vld [vmem:[%s686_s3 + $0x40] sm:$0xff]  ;;  %v145_v17 = vld [vmem:[%s686_s3 + $0x38] sm:$0xff] }
   0x6   :  { %167 = vmatpush1.msra.mxu1 %v151_v5  ;;  %72 = vmatprep.subr.mxu0 %v411_v1  ;;  %v40_v14 = vld [vmem:[%s685_s2 + $0x48] sm:$0xff]  ;;  %v39_v16 = vld [vmem:[%s685_s2 + $0x40] sm:$0xff]  ;;  %v38_v18 = vld [vmem:[%s685_s2 + $0x38] sm:$0xff] }
   0x7   :  { %168 = vmatprep.subr.mxu1 %v411_v1  ;;  %73 = vmatpush1.msra.mxu0 %v44_v6 }
   0x8   :  { %169 = vmatpush1.msra.mxu1 %v150_v7  ;;  %74 = vmatprep.subr.mxu0 %v411_v1 }
   0x9   :  { %170 = vmatprep.subr.mxu1 %v411_v1  ;;  %75 = vmatpush1.msra.mxu0 %v43_v8 }
   0xa   :  { %171 = vmatpush1.msra.mxu1 %v149_v9  ;;  %76 = vmatprep.subr.mxu0 %v411_v1 }
   0xb   :  { %172 = vmatprep.subr.mxu1 %v411_v1  ;;  %77 = vmatpush1.msra.mxu0 %v42_v10 }
   0xc   :  { %173 = vmatpush1.msra.mxu1 %v148_v11  ;;  %78 = vmatprep.subr.mxu0 %v411_v1 }
   0xd   :  { %174 = vmatprep.subr.mxu1 %v411_v1  ;;  %79 = vmatpush1.msra.mxu0 %v41_v12 }
   0xe   :  { %175 = vmatpush1.msra.mxu1 %v147_v13  ;;  %80 = vmatprep.subr.mxu0 %v411_v1 }
   0xf   :  { %176 = vmatprep.subr.mxu1 %v411_v1  ;;  %81 = vmatpush1.msra.mxu0 %v40_v14 }
  0x10   :  { %177 = vmatpush1.msra.mxu1 %v146_v15  ;;  %82 = vmatprep.subr.mxu0 %v411_v1 }
  0x11   :  { %13 = vsyncpa [#allocation3], 0  ;;  %178 = vmatprep.subr.mxu1 %v411_v1  ;;  %v144_v19 = vld [vmem:[%s686_s3 + $0x30] sm:$0xff]  ;;  %83 = vmatpush1.msra.mxu0 %v39_v16  ;;  %v143_v21 = vld [vmem:[%s686_s3 + $0x28] sm:$0xff]  ;;  %vm65_vm0 = vcmask 523264   ;;  %vm412_vm1 = vmmov 0  }
  0x12   :  { %179 = vmatpush1.msra.mxu1 %v145_v17  ;;  %84 = vmatprep.subr.mxu0 %v411_v1  ;;  %v37_v20 = vld [vmem:[%s685_s2 + $0x30] sm:$0xff]  ;;  %v36_v22 = vld [vmem:[%s685_s2 + $0x28] sm:$0xff]  ;;  %v142_v23 = vld [vmem:[%s686_s3 + $0x20] sm:$0xff]  ;;  %vm254_vm2 = vcmask 130048   ;;  %vm336_vm3 = vcmask 33792  }
  0x13   :  { %180 = vmatprep.subr.mxu1 %v411_v1  ;;  %85 = vmatpush1.msra.mxu0 %v38_v18  ;;  %v35_v24 = vld [vmem:[%s685_s2 + $0x20] sm:$0xff]  ;;  %v141_v25 = vld [vmem:[%s686_s3 + $0x18] sm:$0xff]  ;;  %v140_v27 = vld [vmem:[%s686_s3 + $0x10] sm:$0xff] }
  0x14   :  { %181 = vmatpush1.msra.mxu1 %v144_v19  ;;  %86 = vmatprep.subr.mxu0 %v411_v1  ;;  %v34_v26 = vld [vmem:[%s685_s2 + $0x18] sm:$0xff]  ;;  %v33_v28 = vld [vmem:[%s685_s2 + $0x10] sm:$0xff]  ;;  %v139_v29 = vld [vmem:[%s686_s3 + $0x8] sm:$0xff] }
  0x15   :  { %182 = vmatprep.subr.mxu1 %v411_v1  ;;  %87 = vmatpush1.msra.mxu0 %v37_v20  ;;  %v32_v30 = vld [vmem:[%s685_s2 + $0x8] sm:$0xff]  ;;  %v138_v31 = vld [vmem:[%s686_s3] sm:$0xff]  ;;  %v161_v33 = vld [vmem:[%s686_s3 + $0xb8] sm:$0xff] }
  0x16   :  { %183 = vmatpush1.msra.mxu1 %v143_v21  ;;  %88 = vmatprep.subr.mxu0 %v411_v1  ;;  %v31_v32 = vld [vmem:[%s685_s2] sm:$0xff]  ;;  %v54_v35 = vld [vmem:[%s685_s2 + $0xb8] sm:$0xff]  ;;  %v160_v36 = vld [vmem:[%s686_s3 + $0xb0] sm:$0xff] }
  0x17   :  { %184 = vmatprep.subr.mxu1 %v411_v1  ;;  %89 = vmatpush1.msra.mxu0 %v36_v22  ;;  %v363_v34 = vld.sshfl [vmem:[%s683_s0] sm:$0x33 pattern:$0x76325410]  ;;  %v53_v37 = vld [vmem:[%s685_s2 + $0xb0] sm:$0xff]  ;;  %v159_v39 = vld [vmem:[%s686_s3 + $0xa8] sm:$0xff] }
  0x18   :  { %185 = vmatpush1.msra.mxu1 %v142_v23  ;;  %90 = vmatprep.subr.mxu0 %v411_v1  ;;  %v63_v38 = vcombine.high %v363_v34, %v363_v34  ;;  %v158_v40 = vld [vmem:[%s686_s3 + $0xa0] sm:$0xff]  ;;  %v52_v41 = vld [vmem:[%s685_s2 + $0xa8] sm:$0xff]  ;;  %v157_v42 = vld [vmem:[%s686_s3 + $0x98] sm:$0xff] }
  0x19   :  { %186 = vmatprep.subr.mxu1 %v411_v1  ;;  %91 = vmatpush1.msra.mxu0 %v35_v24  ;;  %v51_v43 = vld [vmem:[%s685_s2 + $0xa0] sm:$0xff]  ;;  %v156_v44 = vld [vmem:[%s686_s3 + $0x90] sm:$0xff]  ;;  %v50_v45 = vld [vmem:[%s685_s2 + $0x98] sm:$0xff] }
  0x1a   :  { %187 = vmatpush1.msra.mxu1 %v141_v25  ;;  %92 = vmatprep.subr.mxu0 %v411_v1  ;;  %v155_v46 = vld [vmem:[%s686_s3 + $0x88] sm:$0xff]  ;;  %v49_v47 = vld [vmem:[%s685_s2 + $0x90] sm:$0xff]  ;;  %v154_v48 = vld [vmem:[%s686_s3 + $0x80] sm:$0xff] }
  0x1b   :  { %188 = vmatprep.subr.mxu1 %v411_v1  ;;  %93 = vmatpush1.msra.mxu0 %v34_v26  ;;  %v48_v49 = vld [vmem:[%s685_s2 + $0x88] sm:$0xff]  ;;  %v47_v50 = vld [vmem:[%s685_s2 + $0x80] sm:$0xff] }
  0x1c   :  { %189 = vmatpush1.msra.mxu1 %v140_v27  ;;  %94 = vmatprep.subr.mxu0 %v411_v1  ;;  %v244_v51 = vld [vmem:[%s688_s5 + $0x8] sm:$0xff]  ;;  %v243_v52 = vld [vmem:[%s688_s5] sm:$0xff] }
  0x1d   :  { %190 = vmatprep.subr.mxu1 %v411_v1  ;;  %95 = vmatpush1.msra.mxu0 %v33_v28  ;;  %v366_v58 = vld [vmem:[%s687_s4] ss:$0 sm:$0xff] }
  0x1e   :  { %191 = vmatpush1.msra.mxu1 %v139_v29  ;;  %96 = vmatprep.subr.mxu0 %v411_v1  ;;  %v245_v62 = vld [vmem:[%s684_s1] sm:$0x3]  ;;  %s413_s1 = smov [#allocation2]  }
  0x1f   :  { %192 = vmatprep.subr.mxu1 %v411_v1  ;;  %97 = vmatpush1.msra.mxu0 %v32_v30  ;;  %v367_v63 = vld [vmem:[%s689_s6] ss:$0 sm:$0xff]  ;;  %s355_s4 = sshll.u32 %s413_s1, 4  ;;  %s356_s4 = int_to_ptr.vmem [resolvable:$true] %s355_s4 }
  0x20   :  { %193 = vmatpush1.msra.mxu1 %v138_v31  ;;  %98 = vmatprep.subr.mxu0 %v411_v1  ;;  %v253_v0 = vmul.f32 %v367_v63, %v245_v62  ;;  %v369_v2 = vld [vmem:[%s690_s7] ss:$0 sm:$0xff]  ;;  %s389_s6 = scalar_lea.vmem %s356_s4, 32  ;;  %p394_p1 = scmp.lt.s32.totalorder %s356_s4, %s356_s4 }
  0x21   :  { %210 = vmatprep.subr.mxu1 %v411_v1  ;;  %99 = vmatpush1.msra.mxu0 %v31_v32  ;;  %p390_p0 = scmp.ne.s32.totalorder %s356_s4, %s389_s6  ;;  %p395_p2 = scmp.lt.s32.totalorder %s389_s6, %s389_s6 }
  0x22   :  { %211 = vmatpush2.msra.mxu1 %v161_v33  ;;  %116 = vmatprep.subr.mxu0 %v411_v1 }
  0x23   :  { %212 = vmatprep.subr.mxu1 %v411_v1  ;;  %117 = vmatpush2.msra.mxu0 %v54_v35  ;;  %p396_p3 = por %p395_p2, %p394_p1 }
  0x24   :  { %213 = vmatpush2.msra.mxu1 %v160_v36  ;;  %118 = vmatprep.subr.mxu0 %v411_v1 }
  0x25   :  { %214 = vmatprep.subr.mxu1 %v411_v1  ;;  %119 = vmatpush2.msra.mxu0 %v53_v37  ;;  %p397_p4 = pnand %p396_p3, %p390_p0 }
  0x26   :  { %215 = vmatpush2.msra.mxu1 %v159_v39  ;;  %365 = vmatprep.mubr.msk.f32.mxu1 %vm65_vm0, %v63_v38 }
  0x27   :  { %216 = vmatprep.subr.mxu1 %v411_v1  ;;  %120 = vmatprep.subr.mxu0 %v411_v1 }
  0x28   :  { %217 = vmatpush2.msra.mxu1 %v158_v40  ;;  %121 = vmatpush2.msra.mxu0 %v52_v41 }
  0x29   :  { %218 = vmatprep.subr.mxu1 %v411_v1  ;;  %122 = vmatprep.subr.mxu0 %v411_v1 }
  0x2a   :  { %219 = vmatpush2.msra.mxu1 %v157_v42  ;;  %123 = vmatpush2.msra.mxu0 %v51_v43 }
  0x2b   :  { %220 = vmatprep.subr.mxu1 %v411_v1  ;;  %124 = vmatprep.subr.mxu0 %v411_v1 }
  0x2c   :  { %221 = vmatpush2.msra.mxu1 %v156_v44  ;;  %125 = vmatpush2.msra.mxu0 %v50_v45 }
  0x2d   :  { %222 = vmatprep.subr.mxu1 %v411_v1  ;;  %126 = vmatprep.subr.mxu0 %v411_v1 }
  0x2e   :  { %223 = vmatpush2.msra.mxu1 %v155_v46  ;;  %127 = vmatpush2.msra.mxu0 %v49_v47 }
  0x2f   :  { %224 = vmatprep.subr.mxu1 %v411_v1  ;;  %128 = vmatprep.subr.mxu0 %v411_v1 }
  0x30   :  { %225 = vmatpush2.msra.mxu1 %v154_v48  ;;  %129 = vmatpush2.msra.mxu0 %v48_v49 }
  0x31   :  { %227 = vmatmul.mubr.f32.vlgmr.msra.gmra.mxu1 %v363_v34  ;;  %130 = vmatprep.subr.mxu0 %v411_v1 }
  0x32   :  { %131 = vmatpush2.msra.mxu0 %v47_v50  ;;  %364 = vmatprep.mubr.msk.f32.mxu0 %vm65_vm0, %v63_v38 }
  0x33   :  { %133 = vmatmul.mubr.f32.vlgmr.msra.gmra.mxu0 %v363_v34  ;;  %373 = vmatprep.subr.mxu0 %v411_v1 }
  0x34   :  { %374 = vmatpush3.msra.mxu0 %v244_v51  ;;  %377 = vmatprep.mubr.msk.f32.mxu0 %vm412_vm1, %v411_v1 }
  0x35   :  { %375 = vmatprep.subr.mxu0 %v411_v1 }
  0x36   :  { %376 = vmatpush3.msra.mxu0 %v243_v52 }
  0xf1   :  { %v228_v53 = vpop.f32.mrf.mxu1 }
  0xf2   :  { %383 = vrcp.f32 %v228_v53 }
  0xf3   :  { %v230_v54 = vpop.f32.mrf.mxu1  ;;  %v134_v55 = vpop.f32.mrf.mxu0 }
  0xf5   :  { %v136_v56 = vpop.f32.mrf.mxu0 }
  0xff   :  { %v384_v57 = vpop.eup %383 }
 0x100   :  { %v233_v59 = vmul.f32 %v384_v57, %v134_v55 }
 0x102   :  { %v241_v60 = vadd.f32 %v366_v58, %v233_v59 }
 0x104   :  { %v242_v61 = vmax.f32 %v241_v60, 0.0 }
 0x106   :  { %378 = vmatmul.mubr.msk.f32.vlgmr.msra.gmra.mxu0 %vm254_vm2, %v242_v61 }
 0x1c6   :  { %v324_v1 = vpop.f32.mrf.mxu0 }
 0x1c7   :  { %v325_v3 = vadd.f32 %v324_v1, %v253_v0 }
 0x1c8   :  { %v379_v4 = vpop.f32.mrf.mxu0 }
 0x1c9   :  { %v335_v5 = vadd.f32 %v369_v2, %v325_v3 }
 0x1cb   :  { %v337_v6 = vsel %vm336_vm3, %v335_v5, -inf }
 0x1cc   :  { %338 = vmax.xlane.f32.xlu0 %v337_v6 }
 0x255   :  { %v339_v7 = vpop.xlane.xlu0 %338 }
 0x256   :  { %v340_v8 = vsub.f32 %v335_v5, %v339_v7 }
 0x258   :  { %v341_v9 = vmul.f32 1.442695, %v340_v8 }
 0x25a   :  { %385 = vpow2.f32 %v341_v9 }
 0x267   :  { %v386_v10 = vpop.eup %385 }
 0x268   :  { %v343_v11 = vsel %vm336_vm3, %v386_v10, 0.0 }
 0x269   :  { %344 = vadd.xlane.f32.xlu0 %v343_v11 }
 0x2f2   :  { %v345_v12 = vpop.xlane.xlu0 %344 }
 0x2f3   :  { %387 = vrcp.f32 %v345_v12 }
 0x300   :  { %v388_v13 = vpop.eup %387 }
 0x301   :  { %v347_v14 = vmul.f32 %v388_v13, %v386_v10 }
 0x303   :  { %348 = vst.msk [vmem:[#allocation2] sm:$0x3] %vm336_vm3, %v347_v14 }
 0x304   :  { %400 = shalt.err (!%p397_p4)
}
 0x305   :  { %358 = dma.vmem_to_hbm [thread:$0]  %s356_s4, 32, %s691_s8, [#allocation3]  }
 0x306   :  { %409 = dma.done.wait [#allocation3], 32  }
 0x307   :  { %410 = vsyncadd [#allocation3], 4294967264 }
 0x308   :  { %362 = vsyncpa [#allocation3], 1 }

</bundles_post_ra>
